<compile_context>
chip_gen: v6e
topology: v6e:2x2x1
jax: 0.10.0
libtpu: 0.0.40
codegen_flags: <defaults>
</compile_context>

<pallas_src>
import functools

import jax
import jax.numpy as jnp
from jax.experimental import pallas as pl
from jax.experimental.pallas import tpu as pltpu


def _round_up(x: int, m: int) -> int:
    return ((x + m - 1) // m) * m


def _mlp_kernel(*refs, num_layers: int, relu_flags):
    """Fused MLP over one row-tile for a group of layers.

    refs layout: x_ref, w_0..w_{L-1}, b_0..b_{L-1}, o_ref
      x_ref: (tm, Kp_0)    compute dtype, zero-padded features
      w_l:   (Kp_l, Np_l)  compute dtype, zero-padded weights (in, out) layout
      b_l:   (1, Np_l)     f32, zero-padded bias
      o_ref: (tm, Np_last) output dtype (narrow, lane-dense)
    """
    x_ref = refs[0]
    w_refs = refs[1:1 + num_layers]
    b_refs = refs[1 + num_layers:1 + 2 * num_layers]
    o_ref = refs[1 + 2 * num_layers]

    h = x_ref[...]                                   # (tm, Kp_0) compute dtype
    for l in range(num_layers):                      # static, unrolled
        y = jnp.dot(h, w_refs[l][...], preferred_element_type=jnp.float32)
        y = y + b_refs[l][...]                       # f32 epilogue: bias
        if relu_flags[l]:
            y = jnp.maximum(y, 0.0)                  # f32 epilogue: ReLU
        if l < num_layers - 1:
            h = y.astype(h.dtype)                    # stays on-chip; no scratch
        else:
            o_ref[...] = y.astype(o_ref.dtype)       # narrow lane-dense store


def _fused_group_call(x_p, w_list, b_list, relu_flags, out_dtype, tm, vmem_limit):
    """One pallas_call over a group of layers whose weights fit in VMEM."""
    Mp, Kp0 = x_p.shape
    num_layers = len(w_list)
    Np_last = int(w_list[-1].shape[1])
    grid = (Mp // tm,)

    kernel = functools.partial(
        _mlp_kernel, num_layers=num_layers, relu_flags=tuple(relu_flags))

    flops = 2 * Mp * sum(int(w.shape[0]) * int(w.shape[1]) for w in w_list)
    bytes_accessed = int(
        x_p.size * x_p.dtype.itemsize
        + sum(int(w.size) * w.dtype.itemsize for w in w_list)
        + sum(int(b.size) * b.dtype.itemsize for b in b_list)
        + Mp * Np_last * jnp.dtype(out_dtype).itemsize)
    cost = pl.CostEstimate(flops=flops, transcendentals=0,
                           bytes_accessed=bytes_accessed)

    def run(weight_pipeline_mode):
        def const_spec(arr):
            # Constant index_map: block never changes across the row grid.
            if weight_pipeline_mode is None:
                return pl.BlockSpec(arr.shape, lambda i: (0, 0))
            return pl.BlockSpec(arr.shape, lambda i: (0, 0),
                                pipeline_mode=weight_pipeline_mode)

        in_specs = [pl.BlockSpec((tm, Kp0), lambda i: (i, 0))]      # x row tile
        in_specs += [const_spec(w) for w in w_list]                 # resident W
        in_specs += [const_spec(b) for b in b_list]                 # resident b

        out = pl.pallas_call(
            kernel,
            out_shape=jax.ShapeDtypeStruct((Mp, Np_last), out_dtype),
            grid=grid,
            in_specs=in_specs,
            out_specs=pl.BlockSpec((tm, Np_last), lambda i: (i, 0)),
            compiler_params=pltpu.CompilerParams(
                dimension_semantics=("parallel",),
                vmem_limit_bytes=vmem_limit,
            ),
            cost_estimate=cost,
        )(x_p, *w_list, *b_list)
        return jax.block_until_ready(out)

    try:
        # Single-buffer the constant-index weight/bias blocks (halves their
        # resident VMEM footprint vs. default double-buffering).
        return run(pl.Buffered(1))
    except Exception:
        # TODO(synk): remove fallback once Buffered(1) is supported everywhere.
        return run(None)


def mlp_forward(x, params, *, compute_dtype=jnp.bfloat16, tm_max=512,
                weight_vmem_budget_bytes=None):
    """Forward pass of the MLP (PyTorch semantics: Linear + ReLU between).

    x: array with arbitrary leading dims, last dim = dim_in.
    params: list of (w, b) with w shape (in_features, out_features)
            (transposed vs. PyTorch's (out, in)) and b shape (out_features,).
    """
    lead_shape = x.shape[:-1]
    dim_in = x.shape[-1]
    num_layers = len(params)
    assert num_layers >= 1
    dim_out = params[-1][0].shape[1]
    cdb = jnp.dtype(compute_dtype).itemsize

    # ---- Per-layer padded parameters (zero padding keeps the math exact). ----
    w_list, b_list = [], []
    for (w, b) in params:
        kp = _round_up(w.shape[0], 128)
        np_ = _round_up(w.shape[1], 128)
        wp = jnp.zeros((kp, np_), compute_dtype)
        wp = wp.at[: w.shape[0], : w.shape[1]].set(w.astype(compute_dtype))
        bp = jnp.zeros((1, np_), jnp.float32)
        bp = bp.at[0, : b.shape[0]].set(b.astype(jnp.float32))
        w_list.append(wp)
        b_list.append(bp)

    # ---- Rows: flatten leading dims, pick tm rounded to the sublane packing. --
    h2 = x.reshape(-1, dim_in)
    M = h2.shape[0]
    sublane = {4: 8, 2: 16, 1: 32}[cdb]
    if M <= tm_max:
        # Small M: aim for >=2 row tiles so both v7x TensorCores get work.
        tm = max(sublane, _round_up(pl.cdiv(M, 2), sublane))
        tm = min(tm, _round_up(M, sublane))
    else:
        candidates = [c for c in (1024, 512, 256, 128) if c <= tm_max] or [
            _round_up(tm_max, sublane)]
        tm = None
        for c in candidates:                      # prefer large tiles...
            if _round_up(M, c) - M <= max(M // 8, 0):   # ...if <=12.5% pad rows
                tm = c
                break
        if tm is None:
            tm = min(candidates, key=lambda c: (_round_up(M, c) - M, -c))
    Mp = _round_up(M, tm)

    Kp0 = int(w_list[0].shape[0])
    x_p = jnp.zeros((Mp, Kp0), compute_dtype)
    x_p = x_p.at[:M, :dim_in].set(h2.astype(compute_dtype))

    # ---- Capacity-aware VMEM limit (no hard-coded clamp, no double hedge). ----
    try:
        vmem_cap = int(pltpu.get_tpu_info().vmem_capacity_bytes)
    except Exception:
        vmem_cap = 64 * 2 ** 20   # conservative (v7x per-TC) fallback
    vmem_limit = int(0.8 * vmem_cap)

    # ---- Group layers so each call's resident weights fit the VMEM budget. ----
    layer_bytes = [int(w.size) * cdb + int(b.size) * 4
                   for w, b in zip(w_list, b_list)]
    if weight_vmem_budget_bytes is None:
        weight_vmem_budget_bytes = int(0.6 * vmem_limit)
    groups, cur, cur_b = [], [], 0
    for l, nb in enumerate(layer_bytes):
        if cur and cur_b + nb > weight_vmem_budget_bytes:
            groups.append(cur)
            cur, cur_b = [], 0
        cur.append(l)
        cur_b += nb
    groups.append(cur)

    h_p = x_p
    for gi, group in enumerate(groups):
        is_last_group = gi == len(groups) - 1
        gw = [w_list[l] for l in group]
        gb = [b_list[l] for l in group]
        relu = [l != num_layers - 1 for l in group]
        out_dtype = x.dtype if is_last_group else compute_dtype
        h_p = _fused_group_call(h_p, gw, gb, relu, out_dtype, tm, vmem_limit)

    return h_p[:M, :dim_out].reshape(*lead_shape, dim_out)


def init_mlp_params(key, dim_in, dim_out, dim_hidden, num_layers, bias=True):
    """Deterministic parameter init matching the PyTorch module's shapes."""
    params = []
    for l in range(num_layers):
        d_in = dim_in if l == 0 else dim_hidden
        d_out = dim_out if l == num_layers - 1 else dim_hidden
        key, kw, kb = jax.random.split(key, 3)
        bound = 1.0 / jnp.sqrt(d_in)
        # PyTorch stores weight as (out, in); we store the transpose (in, out).
        w = jax.random.uniform(kw, (d_in, d_out), jnp.float32, -bound, bound)
        if bias:
            b = jax.random.uniform(kb, (d_out,), jnp.float32, -bound, bound)
        else:
            b = jnp.zeros((d_out,), jnp.float32)
        params.append((w, b))
    return params


if __name__ == "__main__":
    # Small, MLP-consistent shapes.
    dim_in, dim_hidden, dim_out, num_layers = 16, 32, 8, 3
    batch, seq = 2, 8  # leading dims; flattened into matmul rows (M = 16)

    key = jax.random.PRNGKey(0)
    kx, kp = jax.random.split(key)
    x = jax.random.normal(kx, (batch, seq, dim_in), jnp.float32)
    params = init_mlp_params(kp, dim_in, dim_out, dim_hidden, num_layers, bias=True)

    # Pure-JAX reference (exact PyTorch semantics in f32).
    ref = x.reshape(-1, dim_in).astype(jnp.float32)
    for l, (w, b) in enumerate(params):
        ref = ref @ w + b
        if l != num_layers - 1:
            ref = jnp.maximum(ref, 0.0)
    ref = ref.reshape(batch, seq, dim_out)

    # 1) Exact-semantics path: f32 MXU inputs.
    out_f32 = jax.block_until_ready(
        mlp_forward(x, params, compute_dtype=jnp.float32))
    assert out_f32.shape == (batch, seq, dim_out)
    assert jnp.allclose(out_f32, ref, atol=1e-5, rtol=1e-5)

    # 2) Optimized path: bf16 MXU inputs, f32 accumulation + f32 epilogue.
    out_bf16 = jax.block_until_ready(
        mlp_forward(x, params, compute_dtype=jnp.bfloat16))
    assert out_bf16.shape == (batch, seq, dim_out)
    assert jnp.allclose(out_bf16, ref, atol=5e-2, rtol=5e-2)

    # 3) Exercise the layer-grouping fallback (weights "too large" for one call).
    out_grp = jax.block_until_ready(
        mlp_forward(x, params, compute_dtype=jnp.float32,
                    weight_vmem_budget_bytes=1))
    assert out_grp.shape == (batch, seq, dim_out)
    assert jnp.allclose(out_grp, ref, atol=1e-5, rtol=1e-5)

    print("KERNEL_OK")
</pallas_src>

<mosaic_0001>
module attributes {stable_mosaic.version = 11 : i64} {
  func.func @_mlp_kernel(%arg0: i32, %arg1: memref<8x128xf32, #tpu.memory_space<vmem>>, %arg2: memref<128x128xf32, #tpu.memory_space<vmem>>, %arg3: memref<128x128xf32, #tpu.memory_space<vmem>>, %arg4: memref<128x128xf32, #tpu.memory_space<vmem>>, %arg5: memref<1x128xf32, #tpu.memory_space<vmem>>, %arg6: memref<1x128xf32, #tpu.memory_space<vmem>>, %arg7: memref<1x128xf32, #tpu.memory_space<vmem>>, %arg8: memref<8x128xf32, #tpu.memory_space<vmem>>) attributes {dimension_semantics = [#tpu.dimension_semantics<parallel>], iteration_bounds = array<i64: 2>, scalar_prefetch = 0 : i64, scratch_operands = 0 : i64, tpu.core_type = #tpu.core_type<tc>, window_params = [{transform_indices = @transform_0, window_bounds = array<i64: 8, 128>}, {pipeline_mode = #tpu.pipeline_mode<synchronous>, transform_indices = @transform_1, window_bounds = array<i64: 128, 128>}, {pipeline_mode = #tpu.pipeline_mode<synchronous>, transform_indices = @transform_2, window_bounds = array<i64: 128, 128>}, {pipeline_mode = #tpu.pipeline_mode<synchronous>, transform_indices = @transform_3, window_bounds = array<i64: 128, 128>}, {pipeline_mode = #tpu.pipeline_mode<synchronous>, transform_indices = @transform_4, window_bounds = array<i64: 1, 128>}, {pipeline_mode = #tpu.pipeline_mode<synchronous>, transform_indices = @transform_5, window_bounds = array<i64: 1, 128>}, {pipeline_mode = #tpu.pipeline_mode<synchronous>, transform_indices = @transform_6, window_bounds = array<i64: 1, 128>}, {transform_indices = @transform_7, window_bounds = array<i64: 8, 128>}]} {
    %c0 = arith.constant 0 : index
    %c0_0 = arith.constant 0 : index
    %0 = vector.load %arg1[%c0, %c0_0] : memref<8x128xf32, #tpu.memory_space<vmem>>, vector<8x128xf32>
    %c0_1 = arith.constant 0 : index
    %c0_2 = arith.constant 0 : index
    %1 = vector.load %arg2[%c0_1, %c0_2] : memref<128x128xf32, #tpu.memory_space<vmem>>, vector<128x128xf32>
    %cst = arith.constant dense<0.000000e+00> : vector<8x128xf32>
    %2 = tpu.matmul %0, %1, %cst {dimension_numbers = #tpu.dot_dimension_numbers<[1], [0], [0], [1], [0, 0, 1, 1], [], []>} : vector<8x128xf32>, vector<128x128xf32>, vector<8x128xf32> -> vector<8x128xf32>
    %c0_3 = arith.constant 0 : index
    %c0_4 = arith.constant 0 : index
    %3 = vector.load %arg5[%c0_3, %c0_4] : memref<1x128xf32, #tpu.memory_space<vmem>>, vector<1x128xf32>
    %4 = vector.broadcast %3 : vector<1x128xf32> to vector<8x128xf32>
    %5 = arith.addf %2, %4 : vector<8x128xf32>
    %cst_5 = arith.constant 0.000000e+00 : f32
    %6 = vector.broadcast %cst_5 : f32 to vector<8x128xf32>
    %7 = arith.maximumf %5, %6 : vector<8x128xf32>
    %c0_6 = arith.constant 0 : index
    %c0_7 = arith.constant 0 : index
    %8 = vector.load %arg3[%c0_6, %c0_7] : memref<128x128xf32, #tpu.memory_space<vmem>>, vector<128x128xf32>
    %cst_8 = arith.constant dense<0.000000e+00> : vector<8x128xf32>
    %9 = tpu.matmul %7, %8, %cst_8 {dimension_numbers = #tpu.dot_dimension_numbers<[1], [0], [0], [1], [0, 0, 1, 1], [], []>} : vector<8x128xf32>, vector<128x128xf32>, vector<8x128xf32> -> vector<8x128xf32>
    %c0_9 = arith.constant 0 : index
    %c0_10 = arith.constant 0 : index
    %10 = vector.load %arg6[%c0_9, %c0_10] : memref<1x128xf32, #tpu.memory_space<vmem>>, vector<1x128xf32>
    %11 = vector.broadcast %10 : vector<1x128xf32> to vector<8x128xf32>
    %12 = arith.addf %9, %11 : vector<8x128xf32>
    %cst_11 = arith.constant 0.000000e+00 : f32
    %13 = vector.broadcast %cst_11 : f32 to vector<8x128xf32>
    %14 = arith.maximumf %12, %13 : vector<8x128xf32>
    %c0_12 = arith.constant 0 : index
    %c0_13 = arith.constant 0 : index
    %15 = vector.load %arg4[%c0_12, %c0_13] : memref<128x128xf32, #tpu.memory_space<vmem>>, vector<128x128xf32>
    %cst_14 = arith.constant dense<0.000000e+00> : vector<8x128xf32>
    %16 = tpu.matmul %14, %15, %cst_14 {dimension_numbers = #tpu.dot_dimension_numbers<[1], [0], [0], [1], [0, 0, 1, 1], [], []>} : vector<8x128xf32>, vector<128x128xf32>, vector<8x128xf32> -> vector<8x128xf32>
    %c0_15 = arith.constant 0 : index
    %c0_16 = arith.constant 0 : index
    %17 = vector.load %arg7[%c0_15, %c0_16] : memref<1x128xf32, #tpu.memory_space<vmem>>, vector<1x128xf32>
    %18 = vector.broadcast %17 : vector<1x128xf32> to vector<8x128xf32>
    %19 = arith.addf %16, %18 : vector<8x128xf32>
    %c0_17 = arith.constant 0 : index
    %c0_18 = arith.constant 0 : index
    %20 = vector.load %arg8[%c0_17, %c0_18] : memref<8x128xf32, #tpu.memory_space<vmem>>, vector<8x128xf32>
    tpu.vector_store %arg8[%c0_17, %c0_18], %19 {strides = array<i32>} : memref<8x128xf32, #tpu.memory_space<vmem>>, vector<8x128xf32>,
    return
  }
  func.func @transform_0(%arg0: i32) -> (i32, i32) {
    %c0_i32 = arith.constant 0 : i32
    %c0_i32_0 = arith.constant 0 : i32
    return %arg0, %c0_i32 : i32, i32
  }
  func.func @transform_1(%arg0: i32) -> (i32, i32) {
    %c0_i32 = arith.constant 0 : i32
    %c0_i32_0 = arith.constant 0 : i32
    %c0_i32_1 = arith.constant 0 : i32
    return %c0_i32, %c0_i32_0 : i32, i32
  }
  func.func @transform_2(%arg0: i32) -> (i32, i32) {
    %c0_i32 = arith.constant 0 : i32
    %c0_i32_0 = arith.constant 0 : i32
    %c0_i32_1 = arith.constant 0 : i32
    return %c0_i32, %c0_i32_0 : i32, i32
  }
  func.func @transform_3(%arg0: i32) -> (i32, i32) {
    %c0_i32 = arith.constant 0 : i32
    %c0_i32_0 = arith.constant 0 : i32
    %c0_i32_1 = arith.constant 0 : i32
    return %c0_i32, %c0_i32_0 : i32, i32
  }
  func.func @transform_4(%arg0: i32) -> (i32, i32) {
    %c0_i32 = arith.constant 0 : i32
    %c0_i32_0 = arith.constant 0 : i32
    %c0_i32_1 = arith.constant 0 : i32
    return %c0_i32, %c0_i32_0 : i32, i32
  }
  func.func @transform_5(%arg0: i32) -> (i32, i32) {
    %c0_i32 = arith.constant 0 : i32
    %c0_i32_0 = arith.constant 0 : i32
    %c0_i32_1 = arith.constant 0 : i32
    return %c0_i32, %c0_i32_0 : i32, i32
  }
  func.func @transform_6(%arg0: i32) -> (i32, i32) {
    %c0_i32 = arith.constant 0 : i32
    %c0_i32_0 = arith.constant 0 : i32
    %c0_i32_1 = arith.constant 0 : i32
    return %c0_i32, %c0_i32_0 : i32, i32
  }
  func.func @transform_7(%arg0: i32) -> (i32, i32) {
    %c0_i32 = arith.constant 0 : i32
    %c0_i32_0 = arith.constant 0 : i32
    return %arg0, %c0_i32 : i32, i32
  }
}

module attributes {stable_mosaic.version = 11 : i64} {
  func.func @_mlp_kernel(%arg0: i32, %arg1: memref<8x128xf32, #tpu.memory_space<vmem>>, %arg2: memref<128x128xf32, #tpu.memory_space<vmem>>, %arg3: memref<128x128xf32, #tpu.memory_space<vmem>>, %arg4: memref<128x128xf32, #tpu.memory_space<vmem>>, %arg5: memref<1x128xf32, #tpu.memory_space<vmem>>, %arg6: memref<1x128xf32, #tpu.memory_space<vmem>>, %arg7: memref<1x128xf32, #tpu.memory_space<vmem>>, %arg8: memref<8x128xf32, #tpu.memory_space<vmem>>) attributes {dimension_semantics = [#tpu.dimension_semantics<parallel>], iteration_bounds = array<i64: 2>, scalar_prefetch = 0 : i64, scratch_operands = 0 : i64, tpu.core_type = #tpu.core_type<tc>, window_params = [{transform_indices = @transform_0, window_bounds = array<i64: 8, 128>}, {pipeline_mode = #tpu.pipeline_mode<synchronous>, transform_indices = @transform_1, window_bounds = array<i64: 128, 128>}, {pipeline_mode = #tpu.pipeline_mode<synchronous>, transform_indices = @transform_2, window_bounds = array<i64: 128, 128>}, {pipeline_mode = #tpu.pipeline_mode<synchronous>, transform_indices = @transform_3, window_bounds = array<i64: 128, 128>}, {pipeline_mode = #tpu.pipeline_mode<synchronous>, transform_indices = @transform_4, window_bounds = array<i64: 1, 128>}, {pipeline_mode = #tpu.pipeline_mode<synchronous>, transform_indices = @transform_5, window_bounds = array<i64: 1, 128>}, {pipeline_mode = #tpu.pipeline_mode<synchronous>, transform_indices = @transform_6, window_bounds = array<i64: 1, 128>}, {transform_indices = @transform_7, window_bounds = array<i64: 8, 128>}]} {
    %c0 = arith.constant 0 : index
    %c0_0 = arith.constant 0 : index
    %0 = vector.load %arg1[%c0, %c0_0] : memref<8x128xf32, #tpu.memory_space<vmem>>, vector<8x128xf32>
    %c0_1 = arith.constant 0 : index
    %c0_2 = arith.constant 0 : index
    %1 = vector.load %arg2[%c0_1, %c0_2] : memref<128x128xf32, #tpu.memory_space<vmem>>, vector<128x128xf32>
    %cst = arith.constant dense<0.000000e+00> : vector<8x128xf32>
    %2 = tpu.matmul %0, %1, %cst {dimension_numbers = #tpu.dot_dimension_numbers<[1], [0], [0], [1], [0, 0, 1, 1], [], []>} : vector<8x128xf32>, vector<128x128xf32>, vector<8x128xf32> -> vector<8x128xf32>
    %c0_3 = arith.constant 0 : index
    %c0_4 = arith.constant 0 : index
    %3 = vector.load %arg5[%c0_3, %c0_4] : memref<1x128xf32, #tpu.memory_space<vmem>>, vector<1x128xf32>
    %4 = vector.broadcast %3 : vector<1x128xf32> to vector<8x128xf32>
    %5 = arith.addf %2, %4 : vector<8x128xf32>
    %cst_5 = arith.constant 0.000000e+00 : f32
    %6 = vector.broadcast %cst_5 : f32 to vector<8x128xf32>
    %7 = arith.maximumf %5, %6 : vector<8x128xf32>
    %c0_6 = arith.constant 0 : index
    %c0_7 = arith.constant 0 : index
    %8 = vector.load %arg3[%c0_6, %c0_7] : memref<128x128xf32, #tpu.memory_space<vmem>>, vector<128x128xf32>
    %cst_8 = arith.constant dense<0.000000e+00> : vector<8x128xf32>
    %9 = tpu.matmul %7, %8, %cst_8 {dimension_numbers = #tpu.dot_dimension_numbers<[1], [0], [0], [1], [0, 0, 1, 1], [], []>} : vector<8x128xf32>, vector<128x128xf32>, vector<8x128xf32> -> vector<8x128xf32>
    %c0_9 = arith.constant 0 : index
    %c0_10 = arith.constant 0 : index
    %10 = vector.load %arg6[%c0_9, %c0_10] : memref<1x128xf32, #tpu.memory_space<vmem>>, vector<1x128xf32>
    %11 = vector.broadcast %10 : vector<1x128xf32> to vector<8x128xf32>
    %12 = arith.addf %9, %11 : vector<8x128xf32>
    %cst_11 = arith.constant 0.000000e+00 : f32
    %13 = vector.broadcast %cst_11 : f32 to vector<8x128xf32>
    %14 = arith.maximumf %12, %13 : vector<8x128xf32>
    %c0_12 = arith.constant 0 : index
    %c0_13 = arith.constant 0 : index
    %15 = vector.load %arg4[%c0_12, %c0_13] : memref<128x128xf32, #tpu.memory_space<vmem>>, vector<128x128xf32>
    %cst_14 = arith.constant dense<0.000000e+00> : vector<8x128xf32>
    %16 = tpu.matmul %14, %15, %cst_14 {dimension_numbers = #tpu.dot_dimension_numbers<[1], [0], [0], [1], [0, 0, 1, 1], [], []>} : vector<8x128xf32>, vector<128x128xf32>, vector<8x128xf32> -> vector<8x128xf32>
    %c0_15 = arith.constant 0 : index
    %c0_16 = arith.constant 0 : index
    %17 = vector.load %arg7[%c0_15, %c0_16] : memref<1x128xf32, #tpu.memory_space<vmem>>, vector<1x128xf32>
    %18 = vector.broadcast %17 : vector<1x128xf32> to vector<8x128xf32>
    %19 = arith.addf %16, %18 : vector<8x128xf32>
    %c0_17 = arith.constant 0 : index
    %c0_18 = arith.constant 0 : index
    %20 = vector.load %arg8[%c0_17, %c0_18] : memref<8x128xf32, #tpu.memory_space<vmem>>, vector<8x128xf32>
    tpu.vector_store %arg8[%c0_17, %c0_18], %19 {strides = array<i32>} : memref<8x128xf32, #tpu.memory_space<vmem>>, vector<8x128xf32>,
    return
  }
  func.func @transform_0(%arg0: i32) -> (i32, i32) {
    %c0_i32 = arith.constant 0 : i32
    %c0_i32_0 = arith.constant 0 : i32
    return %arg0, %c0_i32 : i32, i32
  }
  func.func @transform_1(%arg0: i32) -> (i32, i32) {
    %c0_i32 = arith.constant 0 : i32
    %c0_i32_0 = arith.constant 0 : i32
    %c0_i32_1 = arith.constant 0 : i32
    return %c0_i32, %c0_i32_0 : i32, i32
  }
  func.func @transform_2(%arg0: i32) -> (i32, i32) {
    %c0_i32 = arith.constant 0 : i32
    %c0_i32_0 = arith.constant 0 : i32
    %c0_i32_1 = arith.constant 0 : i32
    return %c0_i32, %c0_i32_0 : i32, i32
  }
  func.func @transform_3(%arg0: i32) -> (i32, i32) {
    %c0_i32 = arith.constant 0 : i32
    %c0_i32_0 = arith.constant 0 : i32
    %c0_i32_1 = arith.constant 0 : i32
    return %c0_i32, %c0_i32_0 : i32, i32
  }
  func.func @transform_4(%arg0: i32) -> (i32, i32) {
    %c0_i32 = arith.constant 0 : i32
    %c0_i32_0 = arith.constant 0 : i32
    %c0_i32_1 = arith.constant 0 : i32
    return %c0_i32, %c0_i32_0 : i32, i32
  }
  func.func @transform_5(%arg0: i32) -> (i32, i32) {
    %c0_i32 = arith.constant 0 : i32
    %c0_i32_0 = arith.constant 0 : i32
    %c0_i32_1 = arith.constant 0 : i32
    return %c0_i32, %c0_i32_0 : i32, i32
  }
  func.func @transform_6(%arg0: i32) -> (i32, i32) {
    %c0_i32 = arith.constant 0 : i32
    %c0_i32_0 = arith.constant 0 : i32
    %c0_i32_1 = arith.constant 0 : i32
    return %c0_i32, %c0_i32_0 : i32, i32
  }
  func.func @transform_7(%arg0: i32) -> (i32, i32) {
    %c0_i32 = arith.constant 0 : i32
    %c0_i32_0 = arith.constant 0 : i32
    return %arg0, %c0_i32 : i32, i32
  }
}

</mosaic_0001>

<bundles_post_ra>
// kernel: tpu_custom_call.1
= control target key start
LH: loop header
LB: loop body
LE: loop exit
PB: predicated region body
PF: predicated region fallthrough
CT: control target
= control target key end

     0   :  { %s1474_s0 = inlined_call_operand.hbm [shape: f32[16,128], index: 0, kind: input, shape index: {}]   ;;  %s1475_s1 = inlined_call_operand.hbm [shape: f32[128,128], index: 1, kind: input, shape index: {}]   ;;  %s1476_s2 = inlined_call_operand.hbm [shape: f32[128,128], index: 2, kind: input, shape index: {}]   ;;  %s1477_s3 = inlined_call_operand.hbm [shape: f32[128,128], index: 3, kind: input, shape index: {}]   ;;  %s1478_s4 = inlined_call_operand.vmem [shape: f32[1,128], index: 4, kind: input, shape index: {}]   ;;  %s1479_s5 = inlined_call_operand.vmem [shape: f32[1,128], index: 5, kind: input, shape index: {}]   ;;  %s1480_s6 = inlined_call_operand.vmem [shape: f32[1,128], index: 6, kind: input, shape index: {}]   ;;  %s1481_s7 = inlined_call_operand.hbm [shape: f32[16,128], index: 7, kind: output, shape index: {}]  }
   0x1   :  { %1486 = sst [smem:[#allocation15_spill]] %s1475_s1 }
   0x2   :  { %1487 = sst [smem:[#allocation16_spill]] %s1476_s2 }
   0x3   :  { %12 = vsyncpa [#allocation3], 0 }
   0x4   :  { %14 = vsyncpa [#allocation3 + $0x1], 0 }
   0x5   :  { %15 = vsyncpa [#allocation6], 0 }
   0x6   :  { %16 = vsyncpa [#allocation9], 0 }
   0x7   :  { %17 = vsyncpa [#allocation4], 0 }
   0x8   :  { %19 = vsyncpa [#allocation4 + $0x1], 0  ;;  %s1221_s24 = smov 0   ;;  %s1223_s25 = smov 0  }
   0x9   :  { %s1225_s26 = smov 0   ;;  %s1227_s27 = smov 0  }
   0xa LB: > { %s1242_s28 = sadd.s32 4294967295, %s1170_s27   ;;  %s734_s29 = sadd.s32 4294967294, %s1170_s27   ;;  %s1170_s27 = sphi %s1227_s27, %s1509_s27   ;;  %s1166_s26 = sphi %s1225_s26, %s1508_s26   ;;  %s1162_s25 = sphi %s1223_s25, %s1507_s25   ;;  %s1158_s24 = sphi %s1221_s24, %s1506_s24  }
   0xb   : > { %p45_p0 = scmp.ne.s32.totalorder %s1162_s25, %s1158_s24  ;;  %p1482_p1 = scmp.eq.s32.totalorder %s1242_s28, 0 }
   0xc   : > { %p201_p3 = scmp.eq.s32.totalorder %s734_s29, 1  ;;  %p735_p5 = scmp.ge.s32.totalorder %s1170_s27, 1 }
   0xd   : > { %p1251_p4 = por %p1482_p1, %p45_p0  ;;  %p208_p7 = scmp.lt.s32.totalorder %s1170_s27, 3 }
   0xe   : > { %p1256_p6 = por %p201_p3, %p45_p0  ;;  %s1172_s10 = smov [#allocation5]  }
   0xf   : > { %s1488_s30 = scalar_select %p1251_p4, 1, 0 }
  0x10   : > { %s1489_s8 = scalar_select %p1256_p6, 1, 0 }
  0x11   : > { %p1261_p8 = pnand %p735_p5, %p208_p7  ;;  %s220_s11 = sshll.u32 %s1172_s10, 4  ;;  %s221_s11 = int_to_ptr.vmem [resolvable:$true] %s220_s11 }
  0x12   : > { %s1173_s13 = smov [#allocation7]   ;;  %s1174_s15 = smov [#allocation8]  }
  0x13   : > { %s1490_s9 = scalar_select %p1261_p8, 1, 0 }
  0x14   : > { %p927_p9 = pneg %p1261_p8  ;;  %s233_s14 = sshll.u32 %s1173_s13, 4  ;;  %s234_s14 = int_to_ptr.vmem [resolvable:$true] %s233_s14 }
  0x15   : > { %s246_s16 = sshll.u32 %s1174_s15, 4  ;;  %s1003_s17 = scalar_lea.vmem %s221_s11, 2048  ;;  %s247_s16 = int_to_ptr.vmem [resolvable:$true] %s246_s16 }
  0x16   : > { %p1270_p11 = pnand %p927_p9, %p1482_p1  ;;  %p1004_p13 = scmp.ne.s32.totalorder %s221_s11, %s1003_s17 }
  0x17   : > { %p1011_p5 = scmp.lt.s32.totalorder %s221_s11, %s221_s11  ;;  %p1012_p7 = scmp.lt.s32.totalorder %s1003_s17, %s1003_s17 }
  0x18   : > { %p994_p12 = pneg %p1270_p11 }
  0x19   : > { %p1013_p9 = por %p1012_p7, %p1011_p5 }
  0x1a   : > { %p1006_p0 = pnand %p1004_p13, %p994_p12 }
  0x1c   : > { %p1007_p3 = pneg %p1006_p0 }
  0x1e   : > { %p1014_p10 = pnand %p1013_p9, %p1007_p3 }
  0x20   : > { %1017 = shalt.err (!%p1014_p10)
}
  0x21   : > { %s1175_s18 = smov 128   ;;  %s1176_s19 = smov 8  }
  0x22   : > { %s1492_s1 = sld [smem:[#allocation15_spill]]  ;;  %s1029_s22 = scalar_lea.vmem %s234_s14, 2048 }
  0x23   : > { %p1030_p1 = scmp.ne.s32.totalorder %s234_s14, %s1029_s22  ;;  %p1037_p2 = scmp.lt.s32.totalorder %s234_s14, %s234_s14 }
  0x24   : > { %p1038_p6 = scmp.lt.s32.totalorder %s1029_s22, %s1029_s22 }
  0x25   : > { %p1032_p13 = pnand %p1030_p1, %p994_p12 }
  0x26   : > { %p1039_p5 = por %p1038_p6, %p1037_p2 }
  0x27   : > { %p1033_p0 = pneg %p1032_p13 }
  0x28   : > { %930 = dma.hbm_to_vmem [thread:$0]  (!%p1270_p11), %s1492_s1, 2048, %s221_s11, [#allocation6], %s1175_s18, %s1175_s18, %s1176_s19  }
  0x29   : > { %p1040_p3 = pnand %p1039_p5, %p1033_p0 }
  0x2b   : > { %1043 = shalt.err (!%p1040_p3)
}
  0x2c   : > { %s1493_s2 = sld [smem:[#allocation16_spill]]  ;;  %s1055_s10 = scalar_lea.vmem %s247_s16, 2048 }
  0x2d   : > { %p1056_p10 = scmp.ne.s32.totalorder %s247_s16, %s1055_s10  ;;  %p1063_p9 = scmp.lt.s32.totalorder %s247_s16, %s247_s16 }
  0x2e   : > { %p1064_p13 = scmp.lt.s32.totalorder %s1055_s10, %s1055_s10 }
  0x2f   : > { %p1058_p7 = pnand %p1056_p10, %p994_p12 }
  0x30   : > { %p1065_p4 = por %p1064_p13, %p1063_p9 }
  0x31   : > { %p1059_p1 = pneg %p1058_p7 }
  0x32   : > { %933 = dma.hbm_to_vmem [thread:$0]  (!%p1270_p11), %s1493_s2, 2048, %s234_s14, [#allocation6], %s1175_s18, %s1175_s18, %s1176_s19  }
  0x33   : > { %p1066_p2 = pnand %p1065_p4, %p1059_p1 }
  0x35   : > { %1069 = shalt.err (!%p1066_p2)
}
  0x36   : > { %936 = dma.hbm_to_vmem [thread:$0]  (!%p1270_p11), %s1477_s3, 2048, %s247_s16, [#allocation9], %s1175_s18, %s1175_s18, %s1176_s19  }
  0x37   : > { %s1301_s14 = sadd.s32 1, %s1170_s27   ;;  %s32_s12 = sadd.s32 1, %s1166_s26 }
  0x38   : > { %s29_s15 = ssub.s32 %s1170_s27, %s1301_s14  ;;  %p39_p6 = scmp.ne.s32.totalorder %s1166_s26, %s1162_s25 }
  0x39   : > { %p30_p4 = scmp.eq.s32.totalorder %s29_s15, 0  ;;  %p40_p12 = scmp.eq.s32.totalorder %s1170_s27, 0 }
  0x3a   : > { %p948_p0 = scmp.lt.s32.totalorder %s1170_s27, 2  ;;  %p1494_p3 = scmp.eq.s32.totalorder %s1242_s28, 1 }
  0x3b   : > { %s1311_s17 = scalar_select %p30_p4, %s1166_s26, %s32_s12  }
  0x3c   : > { %p41_p5 = por %p40_p12, %p39_p6  ;;  %p1315_p10 = por %p1494_p3, %p39_p6 }
  0x3d   : > { %s269_s21 = sand.u32 1, %s1166_s26   ;;  %s741_s22 = sshll.u32 %s1170_s27, 7 }
  0x3e   : > { %s1495_s20 = scalar_select %p1315_p10, 1, 0 }
  0x3f   : > { %s740_s16 = sshll.u32 %s269_s21, 3  ;;  %s1324_s23 = scalar_lea.hbm %s1474_s0, %s741_s22 }
  0x40   : > { %s273_s29 = scalar_lea.vmem [#allocation2], %s740_s16  ;;  %p1326_p11 = pnand %p948_p0, %p41_p5 }
  0x41   : > { %s280_s10 = sshll.u32 %s273_s29, 4  ;;  %s270_s13 = scalar_lea.sflag [#allocation3], %s269_s21  ;;  %s281_s10 = int_to_ptr.vmem [resolvable:$true] %s280_s10 }
  0x42   : > { %s1070_s15 = scalar_lea.hbm %s1324_s23, 128  ;;  %p1072_p1 = pneg %p1326_p11 }
  0x43   : > { %p1071_p7 = scmp.ne.s32.totalorder %s1324_s23, %s1070_s15  ;;  %s1075_s18 = scalar_lea.hbm %s1474_s0, 256 }
  0x44   : > { %p1076_p2 = scmp.lt.s32.totalorder %s1324_s23, %s1474_s0  ;;  %p1077_p4 = scmp.lt.s32.totalorder %s1075_s18, %s1070_s15 }
  0x45   : > { %p1073_p9 = pnand %p1072_p1, %p1071_p7 }
  0x46   : > { %p1078_p6 = por %p1077_p4, %p1076_p2 }
  0x47   : > { %p1074_p13 = pneg %p1073_p9 }
  0x49   : > { %p1079_p12 = pnand %p1078_p6, %p1074_p13 }
  0x4b   : > { %1082 = shalt.err (!%p1079_p12)
}
  0x4c   : > { %s1083_s29 = scalar_lea.vmem %s281_s10, 128  ;;  %s1177_s21 = smov [#allocation2]  }
  0x4d   : > { %p1084_p0 = scmp.ne.s32.totalorder %s281_s10, %s1083_s29  ;;  %s1088_s1 = sshll.u32 %s1177_s21, 4  ;;  %s1089_s1 = int_to_ptr.vmem [resolvable:$false] %s1088_s1 }
  0x4e   : > { %s1090_s2 = scalar_lea.vmem %s1089_s1, 256  ;;  %p1091_p7 = scmp.lt.s32.totalorder %s281_s10, %s1089_s1 }
  0x4f   : > { %p1086_p5 = pnand %p1084_p0, %p1072_p1  ;;  %p1092_p9 = scmp.lt.s32.totalorder %s1090_s2, %s1083_s29 }
  0x51   : > { %p1087_p3 = pneg %p1086_p5  ;;  %p1093_p10 = por %p1092_p9, %p1091_p7 }
  0x53   : > { %p1094_p8 = pnand %p1093_p10, %p1087_p3 }
  0x55   : > { %1097 = shalt.err (!%p1094_p8)
}
  0x56   : > { %940 = dma.hbm_to_vmem [thread:$0]  (!%p1326_p11), %s1324_s23, 128, %s281_s10, %s270_s13  }
  0x57   : > { %p1497_p13 = scmp.ne.s32.totalorder %s1490_s9, 0 }
  0x58   : > { %s1347_s15 = sand.u32 (!%p1497_p13), 1, %s1162_s25   ;;  %p1498_p8 = scmp.ne.s32.totalorder (!%p1497_p13), %s1488_s30, 0 }
  0x59   : > { %289 = sbr.rel (%p1497_p13) target bundleno = 737 (0x2e1), region = 48  ;;  %s743_s12 = sshll.u32 (!%p1497_p13), %s1347_s15, 3 }
  0x5a   : > { %s292_s1 = scalar_lea.sflag (!%p1497_p13), [#allocation3], %s1347_s15  ;;  %s1353_s2 = scalar_lea.vmem (!%p1497_p13), [#allocation2], %s743_s12 }
  0x5e   : > { %1141 = dma.done.wait (%p1498_p8), %s292_s1, 128  }
  0x5f   : > { %1143 = vsyncadd (%p1498_p8), %s292_s1, 4294967168  ;;  %p1499_p10 = scmp.eq.s32.totalorder %s1242_s28, 0 }
  0x61   : > { %1145 = dma.done.wait (%p1499_p10), [#allocation6], 4096   ;;  %p1500_p11 = pmov %p1499_p10 }
  0x62   : > { %p1501_p1 = pmov %p1499_p10 }
  0x63   : > { %1147 = vsyncadd (%p1500_p11), [#allocation6], 4294963200 }
  0x64   : > { %1149 = dma.done.wait (%p1501_p1), [#allocation9], 2048   ;;  %p1502_p2 = pmov %p1501_p1 }
  0x65   : > { %v1178_v0 = vmov 0.0   ;;  %vm1179_vm0 = vmmov 0   ;;  %v354_v1 = vld [vmem:[#allocation5 + $0x78] sm:$0xff]  ;;  %v353_v2 = vld [vmem:[#allocation5 + $0x70] sm:$0xff]  ;;  %v352_v3 = vld [vmem:[#allocation5 + $0x68] sm:$0xff]  ;;  %s752_s22 = sshll.u32 %s1242_s28, 7 }
  0x66   : > { %1151 = vsyncadd (%p1502_p2), [#allocation9], 4294965248  ;;  %806 = vmatprep.subr.mxu0 %v1178_v0  ;;  %838 = vmatprep.mubr.msk.f32.mxu0 %vm1179_vm0, %v1178_v0  ;;  %v351_v4 = vld [vmem:[#allocation5 + $0x60] sm:$0xff]  ;;  %v448_v5 = vld [vmem:[#allocation7 + $0x78] sm:$0xff]  ;;  %s337_s18 = scalar_lea.vmem [#allocation10], %s743_s12  ;;  %s1437_s21 = scalar_lea.hbm %s1481_s7, %s752_s22 }
  0x67   : > { %841 = vmatprep.subr.mxu1 %v1178_v0  ;;  %873 = vmatprep.mubr.msk.f32.mxu1 %vm1179_vm0, %v1178_v0  ;;  %v350_v6 = vld [vmem:[#allocation5 + $0x58] sm:$0xff]  ;;  %v447_v7 = vld [vmem:[#allocation7 + $0x70] sm:$0xff]  ;;  %v446_v8 = vld [vmem:[#allocation7 + $0x68] sm:$0xff]  ;;  %s635_s19 = sshll.u32 %s337_s18, 4  ;;  %s622_s1 = scalar_lea.sflag [#allocation4], %s1347_s15  ;;  %s636_s19 = int_to_ptr.vmem [resolvable:$true] %s635_s19 }
  0x68   : > { %807 = vmatpush3.msra.mxu0 %v354_v1  ;;  %842 = vmatpush3.msra.mxu1 %v448_v5  ;;  %v349_v9 = vld [vmem:[#allocation5 + $0x50] sm:$0xff]  ;;  %v445_v10 = vld [vmem:[#allocation7 + $0x60] sm:$0xff]  ;;  %v348_v11 = vld [vmem:[#allocation5 + $0x48] sm:$0xff]  ;;  %p1503_p6 = scmp.ne.s32.totalorder %s1495_s20, 0  ;;  %s1180_s28 = smov [#allocation10]  }
  0x69   : > { %808 = vmatprep.subr.mxu0 %v1178_v0  ;;  %843 = vmatprep.subr.mxu1 %v1178_v0  ;;  %v444_v12 = vld [vmem:[#allocation7 + $0x58] sm:$0xff]  ;;  %v347_v13 = vld [vmem:[#allocation5 + $0x40] sm:$0xff]  ;;  %v443_v14 = vld [vmem:[#allocation7 + $0x50] sm:$0xff]  ;;  %s1102_s30 = sshll.u32 %s1180_s28, 4  ;;  %s1103_s30 = int_to_ptr.vmem [resolvable:$false] %s1102_s30 }
  0x6a   : > { %809 = vmatpush3.msra.mxu0 %v353_v2  ;;  %844 = vmatpush3.msra.mxu1 %v447_v7  ;;  %v346_v15 = vld [vmem:[#allocation5 + $0x38] sm:$0xff]  ;;  %v442_v16 = vld [vmem:[#allocation7 + $0x48] sm:$0xff]  ;;  %v345_v17 = vld [vmem:[#allocation5 + $0x30] sm:$0xff]  ;;  %s1104_s12 = scalar_lea.vmem %s1103_s30, 256  ;;  %p1105_p5 = scmp.lt.s32.totalorder %s636_s19, %s1103_s30 }
  0x6b   : > { %810 = vmatprep.subr.mxu0 %v1178_v0  ;;  %845 = vmatprep.subr.mxu1 %v1178_v0  ;;  %v441_v18 = vld [vmem:[#allocation7 + $0x40] sm:$0xff]  ;;  %v344_v19 = vld [vmem:[#allocation5 + $0x28] sm:$0xff]  ;;  %v440_v20 = vld [vmem:[#allocation7 + $0x38] sm:$0xff] }
  0x6c   : > { %811 = vmatpush3.msra.mxu0 %v352_v3  ;;  %846 = vmatpush3.msra.mxu1 %v446_v8  ;;  %v343_v21 = vld [vmem:[#allocation5 + $0x20] sm:$0xff]  ;;  %v439_v22 = vld [vmem:[#allocation7 + $0x30] sm:$0xff]  ;;  %v342_v23 = vld [vmem:[#allocation5 + $0x18] sm:$0xff] }
  0x6d   : > { %812 = vmatprep.subr.mxu0 %v1178_v0  ;;  %847 = vmatprep.subr.mxu1 %v1178_v0  ;;  %v438_v24 = vld [vmem:[#allocation7 + $0x28] sm:$0xff]  ;;  %v341_v25 = vld [vmem:[#allocation5 + $0x10] sm:$0xff]  ;;  %v437_v26 = vld [vmem:[#allocation7 + $0x20] sm:$0xff] }
  0x6e   : > { %813 = vmatpush3.msra.mxu0 %v351_v4  ;;  %848 = vmatpush3.msra.mxu1 %v445_v10  ;;  %v340_v27 = vld [vmem:[#allocation5 + $0x8] sm:$0xff]  ;;  %v436_v28 = vld [vmem:[#allocation7 + $0x18] sm:$0xff]  ;;  %v339_v29 = vld [vmem:[#allocation5] sm:$0xff] }
  0x6f   : > { %814 = vmatprep.subr.mxu0 %v1178_v0  ;;  %849 = vmatprep.subr.mxu1 %v1178_v0  ;;  %v338_v30 = vld [vmem:[%s1353_s2] sm:$0xff]  ;;  %v434_v32 = vld [vmem:[#allocation7 + $0x8] sm:$0xff]  ;;  %v433_v33 = vld [vmem:[#allocation7] sm:$0xff]  ;;  %s1098_s2 = scalar_lea.vmem %s636_s19, 128 }
  0x70   : > { %815 = vmatpush3.msra.mxu0 %v350_v6  ;;  %850 = vmatpush3.msra.mxu1 %v444_v12  ;;  %v435_v31 = vld [vmem:[#allocation7 + $0x10] sm:$0xff]  ;;  %v542_v34 = vld [vmem:[#allocation8 + $0x78] sm:$0xff]  ;;  %v540_v36 = vld [vmem:[#allocation8 + $0x68] sm:$0xff]  ;;  %p1099_p4 = scmp.ne.s32.totalorder %s636_s19, %s1098_s2  ;;  %p1106_p3 = scmp.lt.s32.totalorder %s1104_s12, %s1098_s2 }
  0x71   : > { %816 = vmatprep.subr.mxu0 %v1178_v0  ;;  %851 = vmatprep.subr.mxu1 %v1178_v0  ;;  %v541_v35 = vld [vmem:[#allocation8 + $0x70] sm:$0xff]  ;;  %v539_v37 = vld [vmem:[#allocation8 + $0x60] sm:$0xff]  ;;  %v538_v38 = vld [vmem:[#allocation8 + $0x58] sm:$0xff] }
  0x72   : > { %817 = vmatpush3.msra.mxu0 %v349_v9  ;;  %852 = vmatpush3.msra.mxu1 %v443_v14  ;;  %v537_v39 = vld [vmem:[#allocation8 + $0x50] sm:$0xff]  ;;  %v536_v40 = vld [vmem:[#allocation8 + $0x48] sm:$0xff]  ;;  %v535_v41 = vld [vmem:[#allocation8 + $0x40] sm:$0xff]  ;;  %p1100_p12 = pnand %p1099_p4, %p1503_p6  ;;  %p1107_p7 = por %p1106_p3, %p1105_p5 }
  0x73   : > { %818 = vmatprep.subr.mxu0 %v1178_v0  ;;  %853 = vmatprep.subr.mxu1 %v1178_v0  ;;  %v534_v42 = vld [vmem:[#allocation8 + $0x38] sm:$0xff]  ;;  %v533_v43 = vld [vmem:[#allocation8 + $0x30] sm:$0xff]  ;;  %v532_v44 = vld [vmem:[#allocation8 + $0x28] sm:$0xff] }
  0x74   : > { %819 = vmatpush3.msra.mxu0 %v348_v11  ;;  %854 = vmatpush3.msra.mxu1 %v442_v16  ;;  %v531_v45 = vld [vmem:[#allocation8 + $0x20] sm:$0xff]  ;;  %v530_v46 = vld [vmem:[#allocation8 + $0x18] sm:$0xff]  ;;  %v748_v47 = vld [vmem:[%s1478_s4] ss:$0 sm:$0xff]  ;;  %p1101_p0 = pneg %p1100_p12 }
  0x75   : > { %820 = vmatprep.subr.mxu0 %v1178_v0  ;;  %855 = vmatprep.subr.mxu1 %v1178_v0  ;;  %v529_v52 = vld [vmem:[#allocation8 + $0x10] sm:$0xff]  ;;  %v528_v53 = vld [vmem:[#allocation8 + $0x8] sm:$0xff]  ;;  %v527_v54 = vld [vmem:[#allocation8] sm:$0xff] }
  0x76   : > { %821 = vmatpush3.msra.mxu0 %v347_v13  ;;  %856 = vmatpush3.msra.mxu1 %v441_v18  ;;  %v749_v55 = vld [vmem:[%s1479_s5] ss:$0 sm:$0xff]  ;;  %p1108_p9 = pnand %p1107_p7, %p1101_p0 }
  0x77   : > { %822 = vmatprep.subr.mxu0 %v1178_v0  ;;  %857 = vmatprep.subr.mxu1 %v1178_v0  ;;  %v750_v60 = vld [vmem:[%s1480_s6] ss:$0 sm:$0xff] }
  0x78   : > { %823 = vmatpush3.msra.mxu0 %v346_v15  ;;  %858 = vmatpush3.msra.mxu1 %v440_v20 }
  0x79   : > { %824 = vmatprep.subr.mxu0 %v1178_v0  ;;  %859 = vmatprep.subr.mxu1 %v1178_v0 }
  0x7a   : > { %825 = vmatpush3.msra.mxu0 %v345_v17  ;;  %860 = vmatpush3.msra.mxu1 %v439_v22 }
  0x7b   : > { %826 = vmatprep.subr.mxu0 %v1178_v0  ;;  %861 = vmatprep.subr.mxu1 %v1178_v0 }
  0x7c   : > { %827 = vmatpush3.msra.mxu0 %v344_v19  ;;  %862 = vmatpush3.msra.mxu1 %v438_v24 }
  0x7d   : > { %828 = vmatprep.subr.mxu0 %v1178_v0  ;;  %863 = vmatprep.subr.mxu1 %v1178_v0 }
  0x7e   : > { %829 = vmatpush3.msra.mxu0 %v343_v21  ;;  %864 = vmatpush3.msra.mxu1 %v437_v26 }
  0x7f   : > { %830 = vmatprep.subr.mxu0 %v1178_v0  ;;  %865 = vmatprep.subr.mxu1 %v1178_v0 }
  0x80   : > { %831 = vmatpush3.msra.mxu0 %v342_v23  ;;  %866 = vmatpush3.msra.mxu1 %v436_v28 }
  0x81   : > { %832 = vmatprep.subr.mxu0 %v1178_v0  ;;  %867 = vmatprep.subr.mxu1 %v1178_v0 }
  0x82   : > { %833 = vmatpush3.msra.mxu0 %v341_v25  ;;  %868 = vmatpush3.msra.mxu1 %v435_v31 }
  0x83   : > { %834 = vmatprep.subr.mxu0 %v1178_v0  ;;  %869 = vmatprep.subr.mxu1 %v1178_v0 }
  0x84   : > { %835 = vmatpush3.msra.mxu0 %v340_v27  ;;  %870 = vmatpush3.msra.mxu1 %v434_v32 }
  0x85   : > { %836 = vmatprep.subr.mxu0 %v1178_v0  ;;  %871 = vmatprep.subr.mxu1 %v1178_v0 }
  0x86   : > { %837 = vmatpush3.msra.mxu0 %v339_v29  ;;  %872 = vmatpush3.msra.mxu1 %v433_v33 }
  0x87   : > { %839 = vmatmul.mubr.f32.vlgmr.msra.gmra.mxu0 %v338_v30  ;;  %876 = vmatprep.subr.mxu0 %v1178_v0 }
  0x88   : > { %908 = vmatprep.mubr.msk.f32.mxu0 %vm1179_vm0, %v1178_v0  ;;  %877 = vmatpush3.msra.mxu0 %v542_v34 }
  0x89   : > { %878 = vmatprep.subr.mxu0 %v1178_v0 }
  0x8a   : > { %879 = vmatpush3.msra.mxu0 %v541_v35 }
  0x8b   : > { %880 = vmatprep.subr.mxu0 %v1178_v0 }
  0x8c   : > { %881 = vmatpush3.msra.mxu0 %v540_v36 }
  0x8d   : > { %882 = vmatprep.subr.mxu0 %v1178_v0 }
  0x8e   : > { %883 = vmatpush3.msra.mxu0 %v539_v37 }
  0x8f   : > { %884 = vmatprep.subr.mxu0 %v1178_v0 }
  0x90   : > { %885 = vmatpush3.msra.mxu0 %v538_v38 }
  0x91   : > { %886 = vmatprep.subr.mxu0 %v1178_v0 }
  0x92   : > { %887 = vmatpush3.msra.mxu0 %v537_v39 }
  0x93   : > { %888 = vmatprep.subr.mxu0 %v1178_v0 }
  0x94   : > { %889 = vmatpush3.msra.mxu0 %v536_v40 }
  0x95   : > { %890 = vmatprep.subr.mxu0 %v1178_v0 }
  0x96   : > { %891 = vmatpush3.msra.mxu0 %v535_v41 }
  0x97   : > { %892 = vmatprep.subr.mxu0 %v1178_v0 }
  0x98   : > { %893 = vmatpush3.msra.mxu0 %v534_v42 }
  0x99   : > { %894 = vmatprep.subr.mxu0 %v1178_v0 }
  0x9a   : > { %895 = vmatpush3.msra.mxu0 %v533_v43 }
  0x9b   : > { %896 = vmatprep.subr.mxu0 %v1178_v0 }
  0x9c   : > { %897 = vmatpush3.msra.mxu0 %v532_v44 }
  0x9d   : > { %898 = vmatprep.subr.mxu0 %v1178_v0 }
  0x9e   : > { %899 = vmatpush3.msra.mxu0 %v531_v45 }
  0x9f   : > { %900 = vmatprep.subr.mxu0 %v1178_v0 }
  0xa0   : > { %901 = vmatpush3.msra.mxu0 %v530_v46 }
  0xa1   : > { %902 = vmatprep.subr.mxu0 %v1178_v0 }
  0xa2   : > { %903 = vmatpush3.msra.mxu0 %v529_v52 }
  0xa3   : > { %904 = vmatprep.subr.mxu0 %v1178_v0 }
  0xa4   : > { %905 = vmatpush3.msra.mxu0 %v528_v53 }
  0xa5   : > { %906 = vmatprep.subr.mxu0 %v1178_v0 }
  0xa6   : > { %907 = vmatpush3.msra.mxu0 %v527_v54 }
 0x147   : > { %v428_v48 = vpop.f32.mrf.mxu0 }
 0x148   : > { %v429_v49 = vadd.f32 %v748_v47, %v428_v48 }
 0x149   : > { %v840_v50 = vpop.f32.mrf.mxu0 }
 0x14a   : > { %v432_v51 = vmax.f32 %v429_v49, 0.0 }
 0x14c   : > { %874 = vmatmul.mubr.f32.vlgmr.msra.gmra.mxu1 %v432_v51 }
 0x20c   : > { %v522_v56 = vpop.f32.mrf.mxu1 }
 0x20d   : > { %v523_v57 = vadd.f32 %v749_v55, %v522_v56 }
 0x20e   : > { %v875_v58 = vpop.f32.mrf.mxu1 }
 0x20f   : > { %v526_v59 = vmax.f32 %v523_v57, 0.0 }
 0x211   : > { %909 = vmatmul.mubr.f32.vlgmr.msra.gmra.mxu0 %v526_v59 }
 0x2d1   : > { %v616_v61 = vpop.f32.mrf.mxu0 }
 0x2d2   : > { %v617_v62 = vadd.f32 %v750_v60, %v616_v61 }
 0x2d3   : > { %v910_v63 = vpop.f32.mrf.mxu0 }
 0x2d4   : > { %620 = vst [vmem:[%s337_s18] sm:$0xff] %v617_v62 }
 0x2d5   : > { %1111 = shalt.err (!%p1108_p9)
}
 0x2d6   : > { %s1112_s9 = scalar_lea.hbm %s1437_s21, 128  ;;  %s1116_s10 = scalar_lea.hbm %s1481_s7, 256 }
 0x2d7   : > { %p1113_p13 = scmp.ne.s32.totalorder %s1437_s21, %s1112_s9  ;;  %p1117_p11 = scmp.lt.s32.totalorder %s1437_s21, %s1481_s7 }
 0x2d8   : > { %p1118_p1 = scmp.lt.s32.totalorder %s1116_s10, %s1112_s9 }
 0x2d9   : > { %p1114_p8 = pnand %p1113_p13, %p1503_p6 }
 0x2da   : > { %p1119_p2 = por %p1118_p1, %p1117_p11 }
 0x2db   : > { %p1115_p10 = pneg %p1114_p8 }
 0x2dd   : > { %p1120_p4 = pnand %p1119_p2, %p1115_p10 }
 0x2df   : > { %1123 = shalt.err (!%p1120_p4)
}
 0x2e0   : > { %925 = dma.vmem_to_hbm [thread:$0]  (%p1503_p6), %s636_s19, 128, %s1437_s21, %s622_s1  }
 0x2e1 PF: > { %s647_s22 = sand.u32 1, %s1158_s24   ;;  %p1504_p12 = scmp.ne.s32.totalorder %s1489_s8, 0 }
 0x2e2   : > { %p1505_p0 = scmp.ge.s32.totalorder %s1170_s27, 2  ;;  %s648_s18 = scalar_lea.sflag [#allocation4], %s647_s22 }
 0x2e4   : > { %p942_p5 = pnand %p1505_p0, %p1504_p12 }
 0x2e6   : > { %p943_p3 = pneg %p942_p5 }
 0x2e8   : > { %1153 = dma.done.wait (%p943_p3), %s648_s18, 128  }
 0x2e9   : > { %1155 = vsyncadd (%p943_p3), %s648_s18, 4294967168  ;;  %p22_p7 = scmp.ge.s32.totalorder %s1301_s14, 4   ;;  %s1506_s24 = smov %s1162_s25 }
 0x2ea   : > { %s1507_s25 = smov %s1166_s26  ;;  %s1508_s26 = smov %s1311_s17 }
 0x2eb   : > { %s1509_s27 = smov %s1301_s14  ;;  %24 = sbr.rel (!%p22_p7) target bundleno = 10 (0xa), region = 105 }
 0x2f0   :  { %653 = vsyncpa [#allocation3], 1 }
 0x2f1   :  { %655 = vsyncpa [#allocation3 + $0x1], 1 }
 0x2f2   :  { %656 = vsyncpa [#allocation6], 1 }
 0x2f3   :  { %657 = vsyncpa [#allocation9], 1 }
 0x2f4   :  { %658 = vsyncpa [#allocation4], 1 }
 0x2f5   :  { %660 = vsyncpa [#allocation4 + $0x1], 1 }

// kernel: tpu_custom_call.1
= control target key start
LH: loop header
LB: loop body
LE: loop exit
PB: predicated region body
PF: predicated region fallthrough
CT: control target
= control target key end

     0   :  { %s1474_s0 = inlined_call_operand.hbm [shape: f32[16,128], index: 0, kind: input, shape index: {}]   ;;  %s1475_s1 = inlined_call_operand.hbm [shape: f32[128,128], index: 1, kind: input, shape index: {}]   ;;  %s1476_s2 = inlined_call_operand.hbm [shape: f32[128,128], index: 2, kind: input, shape index: {}]   ;;  %s1477_s3 = inlined_call_operand.hbm [shape: f32[128,128], index: 3, kind: input, shape index: {}]   ;;  %s1478_s4 = inlined_call_operand.vmem [shape: f32[1,128], index: 4, kind: input, shape index: {}]   ;;  %s1479_s5 = inlined_call_operand.vmem [shape: f32[1,128], index: 5, kind: input, shape index: {}]   ;;  %s1480_s6 = inlined_call_operand.vmem [shape: f32[1,128], index: 6, kind: input, shape index: {}]   ;;  %s1481_s7 = inlined_call_operand.hbm [shape: f32[16,128], index: 7, kind: output, shape index: {}]  }
   0x1   :  { %1486 = sst [smem:[#allocation15_spill]] %s1475_s1 }
   0x2   :  { %1487 = sst [smem:[#allocation16_spill]] %s1476_s2 }
   0x3   :  { %12 = vsyncpa [#allocation3], 0 }
   0x4   :  { %14 = vsyncpa [#allocation3 + $0x1], 0 }
   0x5   :  { %15 = vsyncpa [#allocation6], 0 }
   0x6   :  { %16 = vsyncpa [#allocation9], 0 }
   0x7   :  { %17 = vsyncpa [#allocation4], 0 }
   0x8   :  { %19 = vsyncpa [#allocation4 + $0x1], 0  ;;  %s1221_s24 = smov 0   ;;  %s1223_s25 = smov 0  }
   0x9   :  { %s1225_s26 = smov 0   ;;  %s1227_s27 = smov 0  }
   0xa LB: > { %s1242_s28 = sadd.s32 4294967295, %s1170_s27   ;;  %s734_s29 = sadd.s32 4294967294, %s1170_s27   ;;  %s1170_s27 = sphi %s1227_s27, %s1509_s27   ;;  %s1166_s26 = sphi %s1225_s26, %s1508_s26   ;;  %s1162_s25 = sphi %s1223_s25, %s1507_s25   ;;  %s1158_s24 = sphi %s1221_s24, %s1506_s24  }
   0xb   : > { %p45_p0 = scmp.ne.s32.totalorder %s1162_s25, %s1158_s24  ;;  %p1482_p1 = scmp.eq.s32.totalorder %s1242_s28, 0 }
   0xc   : > { %p201_p3 = scmp.eq.s32.totalorder %s734_s29, 1  ;;  %p735_p5 = scmp.ge.s32.totalorder %s1170_s27, 1 }
   0xd   : > { %p1251_p4 = por %p1482_p1, %p45_p0  ;;  %p208_p7 = scmp.lt.s32.totalorder %s1170_s27, 3 }
   0xe   : > { %p1256_p6 = por %p201_p3, %p45_p0  ;;  %s1172_s10 = smov [#allocation5]  }
   0xf   : > { %s1488_s30 = scalar_select %p1251_p4, 1, 0 }
  0x10   : > { %s1489_s8 = scalar_select %p1256_p6, 1, 0 }
  0x11   : > { %p1261_p8 = pnand %p735_p5, %p208_p7  ;;  %s220_s11 = sshll.u32 %s1172_s10, 4  ;;  %s221_s11 = int_to_ptr.vmem [resolvable:$true] %s220_s11 }
  0x12   : > { %s1173_s13 = smov [#allocation7]   ;;  %s1174_s15 = smov [#allocation8]  }
  0x13   : > { %s1490_s9 = scalar_select %p1261_p8, 1, 0 }
  0x14   : > { %p927_p9 = pneg %p1261_p8  ;;  %s233_s14 = sshll.u32 %s1173_s13, 4  ;;  %s234_s14 = int_to_ptr.vmem [resolvable:$true] %s233_s14 }
  0x15   : > { %s246_s16 = sshll.u32 %s1174_s15, 4  ;;  %s1003_s17 = scalar_lea.vmem %s221_s11, 2048  ;;  %s247_s16 = int_to_ptr.vmem [resolvable:$true] %s246_s16 }
  0x16   : > { %p1270_p11 = pnand %p927_p9, %p1482_p1  ;;  %p1004_p13 = scmp.ne.s32.totalorder %s221_s11, %s1003_s17 }
  0x17   : > { %p1011_p5 = scmp.lt.s32.totalorder %s221_s11, %s221_s11  ;;  %p1012_p7 = scmp.lt.s32.totalorder %s1003_s17, %s1003_s17 }
  0x18   : > { %p994_p12 = pneg %p1270_p11 }
  0x19   : > { %p1013_p9 = por %p1012_p7, %p1011_p5 }
  0x1a   : > { %p1006_p0 = pnand %p1004_p13, %p994_p12 }
  0x1c   : > { %p1007_p3 = pneg %p1006_p0 }
  0x1e   : > { %p1014_p10 = pnand %p1013_p9, %p1007_p3 }
  0x20   : > { %1017 = shalt.err (!%p1014_p10)
}
  0x21   : > { %s1175_s18 = smov 128   ;;  %s1176_s19 = smov 8  }
  0x22   : > { %s1492_s1 = sld [smem:[#allocation15_spill]]  ;;  %s1029_s22 = scalar_lea.vmem %s234_s14, 2048 }
  0x23   : > { %p1030_p1 = scmp.ne.s32.totalorder %s234_s14, %s1029_s22  ;;  %p1037_p2 = scmp.lt.s32.totalorder %s234_s14, %s234_s14 }
  0x24   : > { %p1038_p6 = scmp.lt.s32.totalorder %s1029_s22, %s1029_s22 }
  0x25   : > { %p1032_p13 = pnand %p1030_p1, %p994_p12 }
  0x26   : > { %p1039_p5 = por %p1038_p6, %p1037_p2 }
  0x27   : > { %p1033_p0 = pneg %p1032_p13 }
  0x28   : > { %930 = dma.hbm_to_vmem [thread:$0]  (!%p1270_p11), %s1492_s1, 2048, %s221_s11, [#allocation6], %s1175_s18, %s1175_s18, %s1176_s19  }
  0x29   : > { %p1040_p3 = pnand %p1039_p5, %p1033_p0 }
  0x2b   : > { %1043 = shalt.err (!%p1040_p3)
}
  0x2c   : > { %s1493_s2 = sld [smem:[#allocation16_spill]]  ;;  %s1055_s10 = scalar_lea.vmem %s247_s16, 2048 }
  0x2d   : > { %p1056_p10 = scmp.ne.s32.totalorder %s247_s16, %s1055_s10  ;;  %p1063_p9 = scmp.lt.s32.totalorder %s247_s16, %s247_s16 }
  0x2e   : > { %p1064_p13 = scmp.lt.s32.totalorder %s1055_s10, %s1055_s10 }
  0x2f   : > { %p1058_p7 = pnand %p1056_p10, %p994_p12 }
  0x30   : > { %p1065_p4 = por %p1064_p13, %p1063_p9 }
  0x31   : > { %p1059_p1 = pneg %p1058_p7 }
  0x32   : > { %933 = dma.hbm_to_vmem [thread:$0]  (!%p1270_p11), %s1493_s2, 2048, %s234_s14, [#allocation6], %s1175_s18, %s1175_s18, %s1176_s19  }
  0x33   : > { %p1066_p2 = pnand %p1065_p4, %p1059_p1 }
  0x35   : > { %1069 = shalt.err (!%p1066_p2)
}
  0x36   : > { %936 = dma.hbm_to_vmem [thread:$0]  (!%p1270_p11), %s1477_s3, 2048, %s247_s16, [#allocation9], %s1175_s18, %s1175_s18, %s1176_s19  }
  0x37   : > { %s1301_s14 = sadd.s32 1, %s1170_s27   ;;  %s32_s12 = sadd.s32 1, %s1166_s26 }
  0x38   : > { %s29_s15 = ssub.s32 %s1170_s27, %s1301_s14  ;;  %p39_p6 = scmp.ne.s32.totalorder %s1166_s26, %s1162_s25 }
  0x39   : > { %p30_p4 = scmp.eq.s32.totalorder %s29_s15, 0  ;;  %p40_p12 = scmp.eq.s32.totalorder %s1170_s27, 0 }
  0x3a   : > { %p948_p0 = scmp.lt.s32.totalorder %s1170_s27, 2  ;;  %p1494_p3 = scmp.eq.s32.totalorder %s1242_s28, 1 }
  0x3b   : > { %s1311_s17 = scalar_select %p30_p4, %s1166_s26, %s32_s12  }
  0x3c   : > { %p41_p5 = por %p40_p12, %p39_p6  ;;  %p1315_p10 = por %p1494_p3, %p39_p6 }
  0x3d   : > { %s269_s21 = sand.u32 1, %s1166_s26   ;;  %s741_s22 = sshll.u32 %s1170_s27, 7 }
  0x3e   : > { %s1495_s20 = scalar_select %p1315_p10, 1, 0 }
  0x3f   : > { %s740_s16 = sshll.u32 %s269_s21, 3  ;;  %s1324_s23 = scalar_lea.hbm %s1474_s0, %s741_s22 }
  0x40   : > { %s273_s29 = scalar_lea.vmem [#allocation2], %s740_s16  ;;  %p1326_p11 = pnand %p948_p0, %p41_p5 }
  0x41   : > { %s280_s10 = sshll.u32 %s273_s29, 4  ;;  %s270_s13 = scalar_lea.sflag [#allocation3], %s269_s21  ;;  %s281_s10 = int_to_ptr.vmem [resolvable:$true] %s280_s10 }
  0x42   : > { %s1070_s15 = scalar_lea.hbm %s1324_s23, 128  ;;  %p1072_p1 = pneg %p1326_p11 }
  0x43   : > { %p1071_p7 = scmp.ne.s32.totalorder %s1324_s23, %s1070_s15  ;;  %s1075_s18 = scalar_lea.hbm %s1474_s0, 256 }
  0x44   : > { %p1076_p2 = scmp.lt.s32.totalorder %s1324_s23, %s1474_s0  ;;  %p1077_p4 = scmp.lt.s32.totalorder %s1075_s18, %s1070_s15 }
  0x45   : > { %p1073_p9 = pnand %p1072_p1, %p1071_p7 }
  0x46   : > { %p1078_p6 = por %p1077_p4, %p1076_p2 }
  0x47   : > { %p1074_p13 = pneg %p1073_p9 }
  0x49   : > { %p1079_p12 = pnand %p1078_p6, %p1074_p13 }
  0x4b   : > { %1082 = shalt.err (!%p1079_p12)
}
  0x4c   : > { %s1083_s29 = scalar_lea.vmem %s281_s10, 128  ;;  %s1177_s21 = smov [#allocation2]  }
  0x4d   : > { %p1084_p0 = scmp.ne.s32.totalorder %s281_s10, %s1083_s29  ;;  %s1088_s1 = sshll.u32 %s1177_s21, 4  ;;  %s1089_s1 = int_to_ptr.vmem [resolvable:$false] %s1088_s1 }
  0x4e   : > { %s1090_s2 = scalar_lea.vmem %s1089_s1, 256  ;;  %p1091_p7 = scmp.lt.s32.totalorder %s281_s10, %s1089_s1 }
  0x4f   : > { %p1086_p5 = pnand %p1084_p0, %p1072_p1  ;;  %p1092_p9 = scmp.lt.s32.totalorder %s1090_s2, %s1083_s29 }
  0x51   : > { %p1087_p3 = pneg %p1086_p5  ;;  %p1093_p10 = por %p1092_p9, %p1091_p7 }
  0x53   : > { %p1094_p8 = pnand %p1093_p10, %p1087_p3 }
  0x55   : > { %1097 = shalt.err (!%p1094_p8)
}
  0x56   : > { %940 = dma.hbm_to_vmem [thread:$0]  (!%p1326_p11), %s1324_s23, 128, %s281_s10, %s270_s13  }
  0x57   : > { %p1497_p13 = scmp.ne.s32.totalorder %s1490_s9, 0 }
  0x58   : > { %s1347_s15 = sand.u32 (!%p1497_p13), 1, %s1162_s25   ;;  %p1498_p8 = scmp.ne.s32.totalorder (!%p1497_p13), %s1488_s30, 0 }
  0x59   : > { %289 = sbr.rel (%p1497_p13) target bundleno = 737 (0x2e1), region = 48  ;;  %s743_s12 = sshll.u32 (!%p1497_p13), %s1347_s15, 3 }
  0x5a   : > { %s292_s1 = scalar_lea.sflag (!%p1497_p13), [#allocation3], %s1347_s15  ;;  %s1353_s2 = scalar_lea.vmem (!%p1497_p13), [#allocation2], %s743_s12 }
  0x5e   : > { %1141 = dma.done.wait (%p1498_p8), %s292_s1, 128  }
  0x5f   : > { %1143 = vsyncadd (%p1498_p8), %s292_s1, 4294967168  ;;  %p1499_p10 = scmp.eq.s32.totalorder %s1242_s28, 0 }
  0x61   : > { %1145 = dma.done.wait (%p1499_p10), [#allocation6], 4096   ;;  %p1500_p11 = pmov %p1499_p10 }
  0x62   : > { %p1501_p1 = pmov %p1499_p10 }
  0x63   : > { %1147 = vsyncadd (%p1500_p11), [#allocation6], 4294963200 }
  0x64   : > { %1149 = dma.done.wait (%p1501_p1), [#allocation9], 2048   ;;  %p1502_p2 = pmov %p1501_p1 }
  0x65   : > { %v1178_v0 = vmov 0.0   ;;  %vm1179_vm0 = vmmov 0   ;;  %v354_v1 = vld [vmem:[#allocation5 + $0x78] sm:$0xff]  ;;  %v353_v2 = vld [vmem:[#allocation5 + $0x70] sm:$0xff]  ;;  %v352_v3 = vld [vmem:[#allocation5 + $0x68] sm:$0xff]  ;;  %s752_s22 = sshll.u32 %s1242_s28, 7 }
  0x66   : > { %1151 = vsyncadd (%p1502_p2), [#allocation9], 4294965248  ;;  %806 = vmatprep.subr.mxu0 %v1178_v0  ;;  %838 = vmatprep.mubr.msk.f32.mxu0 %vm1179_vm0, %v1178_v0  ;;  %v351_v4 = vld [vmem:[#allocation5 + $0x60] sm:$0xff]  ;;  %v448_v5 = vld [vmem:[#allocation7 + $0x78] sm:$0xff]  ;;  %s337_s18 = scalar_lea.vmem [#allocation10], %s743_s12  ;;  %s1437_s21 = scalar_lea.hbm %s1481_s7, %s752_s22 }
  0x67   : > { %841 = vmatprep.subr.mxu1 %v1178_v0  ;;  %873 = vmatprep.mubr.msk.f32.mxu1 %vm1179_vm0, %v1178_v0  ;;  %v350_v6 = vld [vmem:[#allocation5 + $0x58] sm:$0xff]  ;;  %v447_v7 = vld [vmem:[#allocation7 + $0x70] sm:$0xff]  ;;  %v446_v8 = vld [vmem:[#allocation7 + $0x68] sm:$0xff]  ;;  %s635_s19 = sshll.u32 %s337_s18, 4  ;;  %s622_s1 = scalar_lea.sflag [#allocation4], %s1347_s15  ;;  %s636_s19 = int_to_ptr.vmem [resolvable:$true] %s635_s19 }
  0x68   : > { %807 = vmatpush3.msra.mxu0 %v354_v1  ;;  %842 = vmatpush3.msra.mxu1 %v448_v5  ;;  %v349_v9 = vld [vmem:[#allocation5 + $0x50] sm:$0xff]  ;;  %v445_v10 = vld [vmem:[#allocation7 + $0x60] sm:$0xff]  ;;  %v348_v11 = vld [vmem:[#allocation5 + $0x48] sm:$0xff]  ;;  %p1503_p6 = scmp.ne.s32.totalorder %s1495_s20, 0  ;;  %s1180_s28 = smov [#allocation10]  }
  0x69   : > { %808 = vmatprep.subr.mxu0 %v1178_v0  ;;  %843 = vmatprep.subr.mxu1 %v1178_v0  ;;  %v444_v12 = vld [vmem:[#allocation7 + $0x58] sm:$0xff]  ;;  %v347_v13 = vld [vmem:[#allocation5 + $0x40] sm:$0xff]  ;;  %v443_v14 = vld [vmem:[#allocation7 + $0x50] sm:$0xff]  ;;  %s1102_s30 = sshll.u32 %s1180_s28, 4  ;;  %s1103_s30 = int_to_ptr.vmem [resolvable:$false] %s1102_s30 }
  0x6a   : > { %809 = vmatpush3.msra.mxu0 %v353_v2  ;;  %844 = vmatpush3.msra.mxu1 %v447_v7  ;;  %v346_v15 = vld [vmem:[#allocation5 + $0x38] sm:$0xff]  ;;  %v442_v16 = vld [vmem:[#allocation7 + $0x48] sm:$0xff]  ;;  %v345_v17 = vld [vmem:[#allocation5 + $0x30] sm:$0xff]  ;;  %s1104_s12 = scalar_lea.vmem %s1103_s30, 256  ;;  %p1105_p5 = scmp.lt.s32.totalorder %s636_s19, %s1103_s30 }
  0x6b   : > { %810 = vmatprep.subr.mxu0 %v1178_v0  ;;  %845 = vmatprep.subr.mxu1 %v1178_v0  ;;  %v441_v18 = vld [vmem:[#allocation7 + $0x40] sm:$0xff]  ;;  %v344_v19 = vld [vmem:[#allocation5 + $0x28] sm:$0xff]  ;;  %v440_v20 = vld [vmem:[#allocation7 + $0x38] sm:$0xff] }
  0x6c   : > { %811 = vmatpush3.msra.mxu0 %v352_v3  ;;  %846 = vmatpush3.msra.mxu1 %v446_v8  ;;  %v343_v21 = vld [vmem:[#allocation5 + $0x20] sm:$0xff]  ;;  %v439_v22 = vld [vmem:[#allocation7 + $0x30] sm:$0xff]  ;;  %v342_v23 = vld [vmem:[#allocation5 + $0x18] sm:$0xff] }
  0x6d   : > { %812 = vmatprep.subr.mxu0 %v1178_v0  ;;  %847 = vmatprep.subr.mxu1 %v1178_v0  ;;  %v438_v24 = vld [vmem:[#allocation7 + $0x28] sm:$0xff]  ;;  %v341_v25 = vld [vmem:[#allocation5 + $0x10] sm:$0xff]  ;;  %v437_v26 = vld [vmem:[#allocation7 + $0x20] sm:$0xff] }
  0x6e   : > { %813 = vmatpush3.msra.mxu0 %v351_v4  ;;  %848 = vmatpush3.msra.mxu1 %v445_v10  ;;  %v340_v27 = vld [vmem:[#allocation5 + $0x8] sm:$0xff]  ;;  %v436_v28 = vld [vmem:[#allocation7 + $0x18] sm:$0xff]  ;;  %v339_v29 = vld [vmem:[#allocation5] sm:$0xff] }
  0x6f   : > { %814 = vmatprep.subr.mxu0 %v1178_v0  ;;  %849 = vmatprep.subr.mxu1 %v1178_v0  ;;  %v338_v30 = vld [vmem:[%s1353_s2] sm:$0xff]  ;;  %v434_v32 = vld [vmem:[#allocation7 + $0x8] sm:$0xff]  ;;  %v433_v33 = vld [vmem:[#allocation7] sm:$0xff]  ;;  %s1098_s2 = scalar_lea.vmem %s636_s19, 128 }
  0x70   : > { %815 = vmatpush3.msra.mxu0 %v350_v6  ;;  %850 = vmatpush3.msra.mxu1 %v444_v12  ;;  %v435_v31 = vld [vmem:[#allocation7 + $0x10] sm:$0xff]  ;;  %v542_v34 = vld [vmem:[#allocation8 + $0x78] sm:$0xff]  ;;  %v540_v36 = vld [vmem:[#allocation8 + $0x68] sm:$0xff]  ;;  %p1099_p4 = scmp.ne.s32.totalorder %s636_s19, %s1098_s2  ;;  %p1106_p3 = scmp.lt.s32.totalorder %s1104_s12, %s1098_s2 }
  0x71   : > { %816 = vmatprep.subr.mxu0 %v1178_v0  ;;  %851 = vmatprep.subr.mxu1 %v1178_v0  ;;  %v541_v35 = vld [vmem:[#allocation8 + $0x70] sm:$0xff]  ;;  %v539_v37 = vld [vmem:[#allocation8 + $0x60] sm:$0xff]  ;;  %v538_v38 = vld [vmem:[#allocation8 + $0x58] sm:$0xff] }
  0x72   : > { %817 = vmatpush3.msra.mxu0 %v349_v9  ;;  %852 = vmatpush3.msra.mxu1 %v443_v14  ;;  %v537_v39 = vld [vmem:[#allocation8 + $0x50] sm:$0xff]  ;;  %v536_v40 = vld [vmem:[#allocation8 + $0x48] sm:$0xff]  ;;  %v535_v41 = vld [vmem:[#allocation8 + $0x40] sm:$0xff]  ;;  %p1100_p12 = pnand %p1099_p4, %p1503_p6  ;;  %p1107_p7 = por %p1106_p3, %p1105_p5 }
  0x73   : > { %818 = vmatprep.subr.mxu0 %v1178_v0  ;;  %853 = vmatprep.subr.mxu1 %v1178_v0  ;;  %v534_v42 = vld [vmem:[#allocation8 + $0x38] sm:$0xff]  ;;  %v533_v43 = vld [vmem:[#allocation8 + $0x30] sm:$0xff]  ;;  %v532_v44 = vld [vmem:[#allocation8 + $0x28] sm:$0xff] }
  0x74   : > { %819 = vmatpush3.msra.mxu0 %v348_v11  ;;  %854 = vmatpush3.msra.mxu1 %v442_v16  ;;  %v531_v45 = vld [vmem:[#allocation8 + $0x20] sm:$0xff]  ;;  %v530_v46 = vld [vmem:[#allocation8 + $0x18] sm:$0xff]  ;;  %v748_v47 = vld [vmem:[%s1478_s4] ss:$0 sm:$0xff]  ;;  %p1101_p0 = pneg %p1100_p12 }
  0x75   : > { %820 = vmatprep.subr.mxu0 %v1178_v0  ;;  %855 = vmatprep.subr.mxu1 %v1178_v0  ;;  %v529_v52 = vld [vmem:[#allocation8 + $0x10] sm:$0xff]  ;;  %v528_v53 = vld [vmem:[#allocation8 + $0x8] sm:$0xff]  ;;  %v527_v54 = vld [vmem:[#allocation8] sm:$0xff] }
  0x76   : > { %821 = vmatpush3.msra.mxu0 %v347_v13  ;;  %856 = vmatpush3.msra.mxu1 %v441_v18  ;;  %v749_v55 = vld [vmem:[%s1479_s5] ss:$0 sm:$0xff]  ;;  %p1108_p9 = pnand %p1107_p7, %p1101_p0 }
  0x77   : > { %822 = vmatprep.subr.mxu0 %v1178_v0  ;;  %857 = vmatprep.subr.mxu1 %v1178_v0  ;;  %v750_v60 = vld [vmem:[%s1480_s6] ss:$0 sm:$0xff] }
  0x78   : > { %823 = vmatpush3.msra.mxu0 %v346_v15  ;;  %858 = vmatpush3.msra.mxu1 %v440_v20 }
  0x79   : > { %824 = vmatprep.subr.mxu0 %v1178_v0  ;;  %859 = vmatprep.subr.mxu1 %v1178_v0 }
  0x7a   : > { %825 = vmatpush3.msra.mxu0 %v345_v17  ;;  %860 = vmatpush3.msra.mxu1 %v439_v22 }
  0x7b   : > { %826 = vmatprep.subr.mxu0 %v1178_v0  ;;  %861 = vmatprep.subr.mxu1 %v1178_v0 }
  0x7c   : > { %827 = vmatpush3.msra.mxu0 %v344_v19  ;;  %862 = vmatpush3.msra.mxu1 %v438_v24 }
  0x7d   : > { %828 = vmatprep.subr.mxu0 %v1178_v0  ;;  %863 = vmatprep.subr.mxu1 %v1178_v0 }
  0x7e   : > { %829 = vmatpush3.msra.mxu0 %v343_v21  ;;  %864 = vmatpush3.msra.mxu1 %v437_v26 }
  0x7f   : > { %830 = vmatprep.subr.mxu0 %v1178_v0  ;;  %865 = vmatprep.subr.mxu1 %v1178_v0 }
  0x80   : > { %831 = vmatpush3.msra.mxu0 %v342_v23  ;;  %866 = vmatpush3.msra.mxu1 %v436_v28 }
  0x81   : > { %832 = vmatprep.subr.mxu0 %v1178_v0  ;;  %867 = vmatprep.subr.mxu1 %v1178_v0 }
  0x82   : > { %833 = vmatpush3.msra.mxu0 %v341_v25  ;;  %868 = vmatpush3.msra.mxu1 %v435_v31 }
  0x83   : > { %834 = vmatprep.subr.mxu0 %v1178_v0  ;;  %869 = vmatprep.subr.mxu1 %v1178_v0 }
  0x84   : > { %835 = vmatpush3.msra.mxu0 %v340_v27  ;;  %870 = vmatpush3.msra.mxu1 %v434_v32 }
  0x85   : > { %836 = vmatprep.subr.mxu0 %v1178_v0  ;;  %871 = vmatprep.subr.mxu1 %v1178_v0 }
  0x86   : > { %837 = vmatpush3.msra.mxu0 %v339_v29  ;;  %872 = vmatpush3.msra.mxu1 %v433_v33 }
  0x87   : > { %839 = vmatmul.mubr.f32.vlgmr.msra.gmra.mxu0 %v338_v30  ;;  %876 = vmatprep.subr.mxu0 %v1178_v0 }
  0x88   : > { %908 = vmatprep.mubr.msk.f32.mxu0 %vm1179_vm0, %v1178_v0  ;;  %877 = vmatpush3.msra.mxu0 %v542_v34 }
  0x89   : > { %878 = vmatprep.subr.mxu0 %v1178_v0 }
  0x8a   : > { %879 = vmatpush3.msra.mxu0 %v541_v35 }
  0x8b   : > { %880 = vmatprep.subr.mxu0 %v1178_v0 }
  0x8c   : > { %881 = vmatpush3.msra.mxu0 %v540_v36 }
  0x8d   : > { %882 = vmatprep.subr.mxu0 %v1178_v0 }
  0x8e   : > { %883 = vmatpush3.msra.mxu0 %v539_v37 }
  0x8f   : > { %884 = vmatprep.subr.mxu0 %v1178_v0 }
  0x90   : > { %885 = vmatpush3.msra.mxu0 %v538_v38 }
  0x91   : > { %886 = vmatprep.subr.mxu0 %v1178_v0 }
  0x92   : > { %887 = vmatpush3.msra.mxu0 %v537_v39 }
  0x93   : > { %888 = vmatprep.subr.mxu0 %v1178_v0 }
  0x94   : > { %889 = vmatpush3.msra.mxu0 %v536_v40 }
  0x95   : > { %890 = vmatprep.subr.mxu0 %v1178_v0 }
  0x96   : > { %891 = vmatpush3.msra.mxu0 %v535_v41 }
  0x97   : > { %892 = vmatprep.subr.mxu0 %v1178_v0 }
  0x98   : > { %893 = vmatpush3.msra.mxu0 %v534_v42 }
  0x99   : > { %894 = vmatprep.subr.mxu0 %v1178_v0 }
  0x9a   : > { %895 = vmatpush3.msra.mxu0 %v533_v43 }
  0x9b   : > { %896 = vmatprep.subr.mxu0 %v1178_v0 }
  0x9c   : > { %897 = vmatpush3.msra.mxu0 %v532_v44 }
  0x9d   : > { %898 = vmatprep.subr.mxu0 %v1178_v0 }
  0x9e   : > { %899 = vmatpush3.msra.mxu0 %v531_v45 }
  0x9f   : > { %900 = vmatprep.subr.mxu0 %v1178_v0 }
  0xa0   : > { %901 = vmatpush3.msra.mxu0 %v530_v46 }
  0xa1   : > { %902 = vmatprep.subr.mxu0 %v1178_v0 }
  0xa2   : > { %903 = vmatpush3.msra.mxu0 %v529_v52 }
  0xa3   : > { %904 = vmatprep.subr.mxu0 %v1178_v0 }
  0xa4   : > { %905 = vmatpush3.msra.mxu0 %v528_v53 }
  0xa5   : > { %906 = vmatprep.subr.mxu0 %v1178_v0 }
  0xa6   : > { %907 = vmatpush3.msra.mxu0 %v527_v54 }
 0x147   : > { %v428_v48 = vpop.f32.mrf.mxu0 }
 0x148   : > { %v429_v49 = vadd.f32 %v748_v47, %v428_v48 }
 0x149   : > { %v840_v50 = vpop.f32.mrf.mxu0 }
 0x14a   : > { %v432_v51 = vmax.f32 %v429_v49, 0.0 }
 0x14c   : > { %874 = vmatmul.mubr.f32.vlgmr.msra.gmra.mxu1 %v432_v51 }
 0x20c   : > { %v522_v56 = vpop.f32.mrf.mxu1 }
 0x20d   : > { %v523_v57 = vadd.f32 %v749_v55, %v522_v56 }
 0x20e   : > { %v875_v58 = vpop.f32.mrf.mxu1 }
 0x20f   : > { %v526_v59 = vmax.f32 %v523_v57, 0.0 }
 0x211   : > { %909 = vmatmul.mubr.f32.vlgmr.msra.gmra.mxu0 %v526_v59 }
 0x2d1   : > { %v616_v61 = vpop.f32.mrf.mxu0 }
 0x2d2   : > { %v617_v62 = vadd.f32 %v750_v60, %v616_v61 }
 0x2d3   : > { %v910_v63 = vpop.f32.mrf.mxu0 }
 0x2d4   : > { %620 = vst [vmem:[%s337_s18] sm:$0xff] %v617_v62 }
 0x2d5   : > { %1111 = shalt.err (!%p1108_p9)
}
 0x2d6   : > { %s1112_s9 = scalar_lea.hbm %s1437_s21, 128  ;;  %s1116_s10 = scalar_lea.hbm %s1481_s7, 256 }
 0x2d7   : > { %p1113_p13 = scmp.ne.s32.totalorder %s1437_s21, %s1112_s9  ;;  %p1117_p11 = scmp.lt.s32.totalorder %s1437_s21, %s1481_s7 }
 0x2d8   : > { %p1118_p1 = scmp.lt.s32.totalorder %s1116_s10, %s1112_s9 }
 0x2d9   : > { %p1114_p8 = pnand %p1113_p13, %p1503_p6 }
 0x2da   : > { %p1119_p2 = por %p1118_p1, %p1117_p11 }
 0x2db   : > { %p1115_p10 = pneg %p1114_p8 }
 0x2dd   : > { %p1120_p4 = pnand %p1119_p2, %p1115_p10 }
 0x2df   : > { %1123 = shalt.err (!%p1120_p4)
}
 0x2e0   : > { %925 = dma.vmem_to_hbm [thread:$0]  (%p1503_p6), %s636_s19, 128, %s1437_s21, %s622_s1  }
 0x2e1 PF: > { %s647_s22 = sand.u32 1, %s1158_s24   ;;  %p1504_p12 = scmp.ne.s32.totalorder %s1489_s8, 0 }
 0x2e2   : > { %p1505_p0 = scmp.ge.s32.totalorder %s1170_s27, 2  ;;  %s648_s18 = scalar_lea.sflag [#allocation4], %s647_s22 }
 0x2e4   : > { %p942_p5 = pnand %p1505_p0, %p1504_p12 }
 0x2e6   : > { %p943_p3 = pneg %p942_p5 }
 0x2e8   : > { %1153 = dma.done.wait (%p943_p3), %s648_s18, 128  }
 0x2e9   : > { %1155 = vsyncadd (%p943_p3), %s648_s18, 4294967168  ;;  %p22_p7 = scmp.ge.s32.totalorder %s1301_s14, 4   ;;  %s1506_s24 = smov %s1162_s25 }
 0x2ea   : > { %s1507_s25 = smov %s1166_s26  ;;  %s1508_s26 = smov %s1311_s17 }
 0x2eb   : > { %s1509_s27 = smov %s1301_s14  ;;  %24 = sbr.rel (!%p22_p7) target bundleno = 10 (0xa), region = 105 }
 0x2f0   :  { %653 = vsyncpa [#allocation3], 1 }
 0x2f1   :  { %655 = vsyncpa [#allocation3 + $0x1], 1 }
 0x2f2   :  { %656 = vsyncpa [#allocation6], 1 }
 0x2f3   :  { %657 = vsyncpa [#allocation9], 1 }
 0x2f4   :  { %658 = vsyncpa [#allocation4], 1 }
 0x2f5   :  { %660 = vsyncpa [#allocation4 + $0x1], 1 }

</bundles_post_ra>
